<compile_context>
chip_gen: v7x
topology: tpu7x:2x2x1
jax: 0.10.0
libtpu: 0.0.40
codegen_flags: <defaults>
</compile_context>

<pallas_src>
import functools

import jax
import jax.numpy as jnp
from jax import lax
from jax.experimental import pallas as pl
from jax.experimental.pallas import tpu as pltpu


_VMEM_LIMIT_BYTES = 32 * 1024 * 1024   # scoped VMEM requested (fits v5e/v6e/v7x)
_VMEM_TILE_BUDGET = 16 * 1024 * 1024   # target double-buffered working set per kernel
# Row tiles are multiples of 16 so bf16 blocks respect the (16, 128) packed tiling.
_ROW_TILES = (2048, 1024, 512, 256, 128, 64, 32, 16)
_LANE_TILES = (512, 256, 128)


def _round_up(x, m):
    return (x + m - 1) // m * m


def _pad_to(x, shape):
    return jnp.pad(x, [(0, s - d) for d, s in zip(x.shape, shape)])


def _pick_tile(total, candidates, fits):
    for c in candidates:
        if c <= total and total % c == 0 and fits(c):
            return c
    for c in reversed(candidates):
        if c <= total and total % c == 0:
            return c
    return total


def _pick_time_chunk(t, time_chunk, fits):
    """Largest chunk <= time_chunk fitting VMEM; prefer one dividing t (no padding/mask)."""
    cap = max(1, min(time_chunk, t))
    while cap > 1 and not fits(cap):
        cap //= 2
    for tt in range(cap, 0, -1):
        if t % tt == 0:
            if tt >= max(1, cap // 2):
                return tt, False          # exact: no time padding, no per-step mask
            break
    return cap, True                      # pad T up; mask keeps the final carry exact


# -----------------------------------------------------------------------------
# Kernel 1: hoisted, fully parallel input projection  pre = x @ W_ih^T + (b_ih + b_hh).
# -----------------------------------------------------------------------------
def _pregate_kernel(x_ref, wih_ref, b_ref, out_ref):
    out_ref[...] = (jnp.dot(x_ref[...], wih_ref[...],
                            preferred_element_type=jnp.float32)
                    + b_ref[...]).astype(out_ref.dtype)


# -----------------------------------------------------------------------------
# Kernel 2: sequential LSTM recurrence (TT timesteps of one batch tile per grid step).
# -----------------------------------------------------------------------------
def _lstm_kernel(pre_ref, whh_ref, h0_ref, c0_ref,
                 hs_ref, h_out_ref, c_out_ref, *,
                 tt, t_total, hp, unroll, has_padding):
    """h_out/c_out are resident carry blocks across the (inner) time axis."""
    chunk = pl.program_id(1)

    @pl.when(chunk == 0)
    def _():
        h_out_ref[...] = h0_ref[...]
        c_out_ref[...] = c0_ref[...]

    whh = whh_ref[...]                    # bf16 [H_p, 4*H_p], loop-invariant

    def step(s, carry):
        h, c = carry                      # f32 carries; gate math stays f32 (v5e-safe)
        gates = (pre_ref[s].astype(jnp.float32)
                 + jnp.dot(h.astype(jnp.bfloat16), whh,
                           preferred_element_type=jnp.float32))
        i = jax.nn.sigmoid(gates[:, 0 * hp:1 * hp])   # PyTorch gate order [i, f, g, o]
        f = jax.nn.sigmoid(gates[:, 1 * hp:2 * hp])
        g = jnp.tanh(gates[:, 2 * hp:3 * hp])
        o = jax.nn.sigmoid(gates[:, 3 * hp:4 * hp])
        c_new = f * c + i * g
        h_new = o * jnp.tanh(c_new)
        if has_padding:                   # only emitted when T % TT != 0
            valid = (chunk * tt + s) < t_total
            h_new = jnp.where(valid, h_new, h)
            c_new = jnp.where(valid, c_new, c)
        hs_ref[s] = h_new.astype(hs_ref.dtype)
        return (h_new, c_new)

    h, c = lax.fori_loop(0, tt, step, (h_out_ref[...], c_out_ref[...]),
                         unroll=unroll)
    h_out_ref[...] = h
    c_out_ref[...] = c


# -----------------------------------------------------------------------------
# Kernel 3: parallel tiled vocab projection  logits = hs @ W_out^T + b_out.
# -----------------------------------------------------------------------------
def _proj_kernel(hs_ref, wout_ref, bout_ref, out_ref):
    out_ref[...] = (jnp.dot(hs_ref[...], wout_ref[...],
                            preferred_element_type=jnp.float32)
                    + bout_ref[...]).astype(out_ref.dtype)


def language_model_forward(params, words_batch, hidden_batch, *, time_chunk=32):
    """words_batch: [B, T] int32; hidden_batch: (h0, c0) each [1, B, H]."""
    emb = params["embedding"]                       # [V, E]
    wih, whh = params["w_ih"], params["w_hh"]       # [4H, E], [4H, H]
    wout = params["w_out"]                          # [V, H]

    h0 = hidden_batch[0][0]                         # [B, H]
    c0 = hidden_batch[1][0]                         # [B, H]

    B, T = words_batch.shape
    V, E = emb.shape
    H = h0.shape[-1]

    f32, bf16 = jnp.float32, jnp.bfloat16

    # Padded sizes: 16 sublanes on batch/row dims (bf16 packed tiling), 128 lanes on features.
    B_p = _round_up(B, 16)
    E_p = _round_up(E, 128)
    H_p = _round_up(H, 128)
    V_p = _round_up(V, 128)
    G_p = 4 * H_p

    # Batch-tile split (v7x has 2 TensorCores): only when each tile stays MXU-dense,
    # so single-core generations (v5e/v6e) are not slowed down by extra sequential chunks.
    nbt = 2 if (B_p >= 256 and B_p % 32 == 0) else 1
    bt = B_p // nbt

    # Time chunk: amortize ~0.35us/grid-step overhead while keeping the chunk in VMEM.
    def _lstm_fits(tt_):
        ws = (2 * tt_ * bt * (G_p + H_p) * 2        # pre-gates + hs chunks (bf16, dbuf)
              + H_p * G_p * 2                       # resident W_hh^T (bf16)
              + 4 * bt * H_p * 4)                   # h0/c0/h_n/c_n (f32)
        return ws <= _VMEM_TILE_BUDGET
    TT, has_padding = _pick_time_chunk(T, time_chunk, _lstm_fits)
    T_p = _round_up(T, TT)

    # Pre-transposed weights; gate blocks padded independently so gate k lives at lanes
    # [k*H_p, k*H_p + H) -> lane-aligned gate slices in-kernel.  MXU operands in bf16.
    wih_t = _pad_to(jnp.transpose(wih).reshape(E, 4, H).astype(f32),
                    (E_p, 4, H_p)).reshape(E_p, G_p).astype(bf16)
    whh_t = _pad_to(jnp.transpose(whh).reshape(H, 4, H).astype(f32),
                    (H_p, 4, H_p)).reshape(H_p, G_p).astype(bf16)
    b_gate = _pad_to((params["b_ih"] + params["b_hh"]).reshape(4, H).astype(f32),
                     (4, H_p)).reshape(1, G_p)
    wout_t = _pad_to(jnp.transpose(wout).astype(f32), (H_p, V_p)).astype(bf16)
    bout = _pad_to(params["b_out"][None, :].astype(f32), (1, V_p))

    h0_p = _pad_to(h0.astype(f32), (B_p, H_p))
    c0_p = _pad_to(c0.astype(f32), (B_p, H_p))

    # Embedding gather: plain-JAX glue, done directly in bf16 and time-major (transpose the
    # int32 indices, not the activation) so only one half-width activation hits HBM.
    # TODO(synk): fuse the gather into the pre-gate kernel (scalar-prefetched token ids) to
    # remove this remaining activation round trip through HBM.
    x_tm = jnp.take(emb.astype(bf16), jnp.transpose(words_batch), axis=0)   # [T, B, E]
    x_tm = _pad_to(x_tm, (T_p, B_p, E_p))
    Mx = T_p * B_p
    x_flat = x_tm.reshape(Mx, E_p)

    # ---- Kernel 1: hoisted input projection (fully parallel, off the serial path) ----
    def _tg_fits(tg_):
        return 2 * (8 * E_p * 2 + E_p * tg_ * 2 + tg_ * 4 + 8 * tg_ * 2) <= _VMEM_TILE_BUDGET
    tile_g = _pick_tile(G_p, _LANE_TILES, _tg_fits)

    def _tmx_fits(tm_):
        return (2 * (tm_ * E_p * 2 + E_p * tile_g * 2 + tile_g * 4 + tm_ * tile_g * 2)
                <= _VMEM_TILE_BUDGET)
    tile_mx = _pick_tile(Mx, _ROW_TILES, _tmx_fits)

    pre_flat = pl.pallas_call(
        _pregate_kernel,
        out_shape=jax.ShapeDtypeStruct((Mx, G_p), bf16),
        grid_spec=pltpu.PrefetchScalarGridSpec(
            num_scalar_prefetch=0,
            grid=(Mx // tile_mx, G_p // tile_g),        # rows outer: each x tile DMA'd once
            in_specs=[
                pl.BlockSpec((tile_mx, E_p), lambda i, j: (i, 0)),      # x rows
                pl.BlockSpec((E_p, tile_g), lambda i, j: (0, j)),       # W_ih^T tile
                pl.BlockSpec((1, tile_g), lambda i, j: (0, j)),         # bias tile
            ],
            out_specs=pl.BlockSpec((tile_mx, tile_g), lambda i, j: (i, j)),
        ),
        compiler_params=pltpu.CompilerParams(
            dimension_semantics=("parallel", "parallel"),
            vmem_limit_bytes=_VMEM_LIMIT_BYTES),
    )(x_flat, wih_t, b_gate)
    pre_tm = pre_flat.reshape(T_p, B_p, G_p)

    # ---- Kernel 2: sequential LSTM recurrence (only h @ W_hh^T per step) ----
    lstm_kernel = functools.partial(_lstm_kernel, tt=TT, t_total=T, hp=H_p,
                                    unroll=min(8, TT), has_padding=has_padding)
    hs_p, h_n_p, c_n_p = pl.pallas_call(
        lstm_kernel,
        out_shape=(
            jax.ShapeDtypeStruct((T_p, B_p, H_p), bf16),
            jax.ShapeDtypeStruct((B_p, H_p), f32),
            jax.ShapeDtypeStruct((B_p, H_p), f32),
        ),
        grid_spec=pltpu.PrefetchScalarGridSpec(
            num_scalar_prefetch=0,
            grid=(nbt, T_p // TT),
            in_specs=[
                pl.BlockSpec((TT, bt, G_p), lambda b, c: (c, b, 0)),    # pre-gates chunk
                pl.BlockSpec((H_p, G_p), lambda b, c: (0, 0)),          # W_hh^T (resident)
                pl.BlockSpec((bt, H_p), lambda b, c: (b, 0)),           # h0 tile
                pl.BlockSpec((bt, H_p), lambda b, c: (b, 0)),           # c0 tile
            ],
            out_specs=(
                pl.BlockSpec((TT, bt, H_p), lambda b, c: (c, b, 0)),    # hs chunk (bf16)
                pl.BlockSpec((bt, H_p), lambda b, c: (b, 0)),           # h_n (resident)
                pl.BlockSpec((bt, H_p), lambda b, c: (b, 0)),           # c_n (resident)
            ),
        ),
        compiler_params=pltpu.CompilerParams(
            dimension_semantics=("parallel", "arbitrary"),   # batch tiles ||, time serial
            vmem_limit_bytes=_VMEM_LIMIT_BYTES),
    )(pre_tm, whh_t, h0_p, c0_p)

    # ---- Kernel 3: parallel vocab projection, outside the recurrent loop ----
    M = T_p * B_p
    hs_flat = hs_p.reshape(M, H_p)

    def _tv_fits(tv_):
        return 2 * (8 * H_p * 2 + H_p * tv_ * 2 + tv_ * 4 + 8 * tv_ * 4) <= _VMEM_TILE_BUDGET
    tile_v = _pick_tile(V_p, _LANE_TILES, _tv_fits)

    hs_resident = (2 * (M * H_p * 2 + H_p * tile_v * 2 + tile_v * 4 + M * tile_v * 4)
                   <= _VMEM_TILE_BUDGET)
    if hs_resident:
        # hs stays resident in VMEM across the grid -> W_out^T is streamed exactly once.
        grid = (V_p // tile_v,)
        in_specs = [pl.BlockSpec((M, H_p), lambda j: (0, 0)),
                    pl.BlockSpec((H_p, tile_v), lambda j: (0, j)),
                    pl.BlockSpec((1, tile_v), lambda j: (0, j))]
        out_specs = pl.BlockSpec((M, tile_v), lambda j: (0, j))
        dims = ("parallel",)
    else:
        # Large row tiles minimize how many times the full W_out^T is re-streamed.
        def _tm_fits(tm_):
            return (2 * (tm_ * H_p * 2 + H_p * tile_v * 2 + tile_v * 4 + tm_ * tile_v * 4)
                    <= _VMEM_TILE_BUDGET)
        tile_m = _pick_tile(M, _ROW_TILES, _tm_fits)
        grid = (M // tile_m, V_p // tile_v)
        in_specs = [pl.BlockSpec((tile_m, H_p), lambda i, j: (i, 0)),
                    pl.BlockSpec((H_p, tile_v), lambda i, j: (0, j)),
                    pl.BlockSpec((1, tile_v), lambda i, j: (0, j))]
        out_specs = pl.BlockSpec((tile_m, tile_v), lambda i, j: (i, j))
        dims = ("parallel", "parallel")

    # TODO(synk): for very large vocab, emit bf16 logits or fuse the softmax/loss here to
    # halve the dominant [M, V] output write; kept f32 for numerical parity with PyTorch.
    logits_flat = pl.pallas_call(
        _proj_kernel,
        out_shape=jax.ShapeDtypeStruct((M, V_p), f32),
        grid_spec=pltpu.PrefetchScalarGridSpec(
            num_scalar_prefetch=0, grid=grid,
            in_specs=in_specs, out_specs=out_specs),
        compiler_params=pltpu.CompilerParams(
            dimension_semantics=dims,
            vmem_limit_bytes=_VMEM_LIMIT_BYTES),
    )(hs_flat, wout_t, bout)

    logits = logits_flat.reshape(T_p, B_p, V_p)[:T, :B, :V]
    logits = jnp.transpose(logits, (1, 0, 2))        # [B, T, V] (batch_first)
    h_n = h_n_p[:B, :H]
    c_n = c_n_p[:B, :H]
    return logits, (h_n[None], c_n[None])            # hidden shaped like PyTorch (1, B, H)


def ref_forward(params, words_batch, hidden_batch):
    """Pure-JAX f32 reference matching PyTorch nn.LSTM + nn.Linear semantics."""
    emb = jnp.take(params["embedding"], words_batch, axis=0)   # [B, T, E]
    h, c = hidden_batch[0][0], hidden_batch[1][0]
    wih, whh = params["w_ih"], params["w_hh"]
    b = params["b_ih"] + params["b_hh"]
    H = h.shape[-1]

    def step(carry, x_t):
        h, c = carry
        gates = x_t @ wih.T + h @ whh.T + b
        i = jax.nn.sigmoid(gates[:, :H])
        f = jax.nn.sigmoid(gates[:, H:2 * H])
        g = jnp.tanh(gates[:, 2 * H:3 * H])
        o = jax.nn.sigmoid(gates[:, 3 * H:])
        c = f * c + i * g
        h = o * jnp.tanh(c)
        return (h, c), h

    (h, c), hs = jax.lax.scan(step, (h, c), jnp.transpose(emb, (1, 0, 2)))
    hs = jnp.transpose(hs, (1, 0, 2))                           # [B, T, H]
    logits = hs @ params["w_out"].T + params["b_out"]
    return logits, (h[None], c[None])


def init_params(key, n_words, embedding_dim, hidden_dim):
    ks = jax.random.split(key, 7)
    s = 0.1
    return {
        "embedding": s * jax.random.normal(ks[0], (n_words, embedding_dim), jnp.float32),
        "w_ih": s * jax.random.normal(ks[1], (4 * hidden_dim, embedding_dim), jnp.float32),
        "w_hh": s * jax.random.normal(ks[2], (4 * hidden_dim, hidden_dim), jnp.float32),
        "b_ih": s * jax.random.normal(ks[3], (4 * hidden_dim,), jnp.float32),
        "b_hh": s * jax.random.normal(ks[4], (4 * hidden_dim,), jnp.float32),
        "w_out": s * jax.random.normal(ks[5], (n_words, hidden_dim), jnp.float32),
        "b_out": s * jax.random.normal(ks[6], (n_words,), jnp.float32),
    }


if __name__ == "__main__":
    n_words, embedding_dim, hidden_dim = 64, 32, 32
    batch_size, seq_len = 2, 8

    key = jax.random.PRNGKey(0)
    k_par, k_words, k_h0, k_c0 = jax.random.split(key, 4)

    params = init_params(k_par, n_words, embedding_dim, hidden_dim)
    words_batch = jax.random.randint(k_words, (batch_size, seq_len), 0, n_words,
                                     dtype=jnp.int32)
    # Module draws torch.randn for the initial hidden when None; use deterministic normal here.
    hidden_batch = (jax.random.normal(k_h0, (1, batch_size, hidden_dim), jnp.float32),
                    jax.random.normal(k_c0, (1, batch_size, hidden_dim), jnp.float32))

    logits, (h_n, c_n) = language_model_forward(params, words_batch, hidden_batch)
    jax.block_until_ready((logits, h_n, c_n))

    ref_logits, (ref_h, ref_c) = ref_forward(params, words_batch, hidden_batch)
    assert logits.shape == (batch_size, seq_len, n_words)
    assert h_n.shape == (1, batch_size, hidden_dim)
    # bf16 MXU operands vs. a pure-f32 reference -> loosened tolerances (f32 accumulation kept).
    assert jnp.allclose(logits, ref_logits, rtol=3e-2, atol=3e-2)
    assert jnp.allclose(h_n, ref_h, rtol=3e-2, atol=3e-2)
    assert jnp.allclose(c_n, ref_c, rtol=3e-2, atol=3e-2)

    print("KERNEL_OK")
</pallas_src>

<mosaic_0001>
module attributes {stable_mosaic.version = 11 : i64} {
  func.func @_pregate_kernel(%arg0: i32, %arg1: i32, %arg2: memref<128x128xbf16, #tpu.memory_space<vmem>>, %arg3: memref<128x512xbf16, #tpu.memory_space<vmem>>, %arg4: memref<1x512xf32, #tpu.memory_space<vmem>>, %arg5: memref<128x512xbf16, #tpu.memory_space<vmem>>) attributes {dimension_semantics = [#tpu.dimension_semantics<parallel>, #tpu.dimension_semantics<parallel>], iteration_bounds = array<i64: 1, 1>, scalar_prefetch = 0 : i64, scratch_operands = 0 : i64, tpu.core_type = #tpu.core_type<tc>, window_params = [{transform_indices = @transform_0, window_bounds = array<i64: 128, 128>}, {transform_indices = @transform_1, window_bounds = array<i64: 128, 512>}, {transform_indices = @transform_2, window_bounds = array<i64: 1, 512>}, {transform_indices = @transform_3, window_bounds = array<i64: 128, 512>}]} {
    %c0 = arith.constant 0 : index
    %c0_0 = arith.constant 0 : index
    %0 = vector.load %arg2[%c0, %c0_0] : memref<128x128xbf16, #tpu.memory_space<vmem>>, vector<128x128xbf16>
    %c0_1 = arith.constant 0 : index
    %c0_2 = arith.constant 0 : index
    %1 = vector.load %arg3[%c0_1, %c0_2] : memref<128x512xbf16, #tpu.memory_space<vmem>>, vector<128x512xbf16>
    %cst = arith.constant dense<0.000000e+00> : vector<128x512xf32>
    %2 = tpu.matmul %0, %1, %cst {dimension_numbers = #tpu.dot_dimension_numbers<[1], [0], [0], [1], [0, 0, 1, 1], [], []>} : vector<128x128xbf16>, vector<128x512xbf16>, vector<128x512xf32> -> vector<128x512xf32>
    %c0_3 = arith.constant 0 : index
    %c0_4 = arith.constant 0 : index
    %3 = vector.load %arg4[%c0_3, %c0_4] : memref<1x512xf32, #tpu.memory_space<vmem>>, vector<1x512xf32>
    %4 = vector.broadcast %3 : vector<1x512xf32> to vector<128x512xf32>
    %5 = arith.addf %2, %4 : vector<128x512xf32>
    %6 = arith.truncf %5 : vector<128x512xf32> to vector<128x512xbf16>
    %c0_5 = arith.constant 0 : index
    %c0_6 = arith.constant 0 : index
    %7 = vector.load %arg5[%c0_5, %c0_6] : memref<128x512xbf16, #tpu.memory_space<vmem>>, vector<128x512xbf16>
    tpu.vector_store %arg5[%c0_5, %c0_6], %6 {strides = array<i32>} : memref<128x512xbf16, #tpu.memory_space<vmem>>, vector<128x512xbf16>,
    return
  }
  func.func @transform_0(%arg0: i32, %arg1: i32) -> (i32, i32) {
    %c0_i32 = arith.constant 0 : i32
    %c0_i32_0 = arith.constant 0 : i32
    return %arg0, %c0_i32 : i32, i32
  }
  func.func @transform_1(%arg0: i32, %arg1: i32) -> (i32, i32) {
    %c0_i32 = arith.constant 0 : i32
    %c0_i32_0 = arith.constant 0 : i32
    return %c0_i32, %arg1 : i32, i32
  }
  func.func @transform_2(%arg0: i32, %arg1: i32) -> (i32, i32) {
    %c0_i32 = arith.constant 0 : i32
    %c0_i32_0 = arith.constant 0 : i32
    return %c0_i32, %arg1 : i32, i32
  }
  func.func @transform_3(%arg0: i32, %arg1: i32) -> (i32, i32) {
    %c0_i32 = arith.constant 0 : i32
    return %arg0, %arg1 : i32, i32
  }
}

</mosaic_0001>

<bundles_post_ra>
// kernel: tpu_custom_call.1
= control target key start
LH: loop header
LB: loop body
LE: loop exit
PB: predicated region body
PF: predicated region fallthrough
CT: control target
= control target key end

     0   :  { %8 = vsyncpa [#allocation3], 0  ;;  %s1191_s0 = inlined_call_operand.hbm [shape: bf16[128,128], index: 0, kind: input, shape index: {}]   ;;  %s1192_s1 = inlined_call_operand.hbm [shape: bf16[128,512], index: 1, kind: input, shape index: {}]   ;;  %s1193_s2 = inlined_call_operand.vmem [shape: f32[1,512], index: 2, kind: input, shape index: {}]   ;;  %s1194_s3 = inlined_call_operand.hbm [shape: bf16[128,512], index: 3, kind: output, shape index: {}]  }
   0x1   :  { %9 = vsyncpa [#allocation6], 0 }
   0x2   :  { %10 = vsyncpa [#allocation4], 0  ;;  %s1030_s12 = smov [#allocation2]   ;;  %s958_s16 = scalar_lea.hbm %s1191_s0, 1024 }
   0x3   :  { %s16_s13 = sshll.u32 %s1030_s12, 4  ;;  %p959_p0 = scmp.ne.s32.totalorder %s1191_s0, %s958_s16  ;;  %s17_s13 = int_to_ptr.vmem [resolvable:$true] %s16_s13 }
   0x4   :  { %p962_p1 = scmp.lt.u32.totalorder %s958_s16, %s1191_s0 }
   0x6   :  { %p964_p2 = pnand %p962_p1, %p959_p0 }
   0x8   :  { %967 = shalt.err (!%p964_p2)
}
   0x9   :  { %s968_s21 = scalar_lea.vmem %s17_s13, 1024  ;;  %p973_p4 = scmp.lt.s32.totalorder %s17_s13, %s17_s13 }
   0xa   :  { %p969_p3 = scmp.ne.s32.totalorder %s17_s13, %s968_s21  ;;  %p974_p5 = scmp.lt.s32.totalorder %s968_s21, %s968_s21 }
   0xc   :  { %p975_p6 = por %p974_p5, %p973_p4 }
   0xe   :  { %p976_p7 = pnand %p975_p6, %p969_p3 }
  0x10   :  { %979 = shalt.err (!%p976_p7)
}
  0x11   :  { %s1031_s22 = smov 64   ;;  %s1032_s23 = smov 4  }
  0x12   :  { %22 = dma.hbm_to_vmem [thread:$0]  %s1191_s0, 1024, %s17_s13, [#allocation3], %s1031_s22, %s1031_s22, %s1032_s23  }
  0x13   :  { %s1033_s26 = smov [#allocation5]   ;;  %s980_s30 = scalar_lea.hbm %s1192_s1, 4096 }
  0x14   :  { %s28_s27 = sshll.u32 %s1033_s26, 4  ;;  %p981_p8 = scmp.ne.s32.totalorder %s1192_s1, %s980_s30  ;;  %s29_s27 = int_to_ptr.vmem [resolvable:$true] %s28_s27 }
  0x15   :  { %p984_p9 = scmp.lt.u32.totalorder %s980_s30, %s1192_s1 }
  0x17   :  { %p986_p10 = pnand %p984_p9, %p981_p8 }
  0x19   :  { %989 = shalt.err (!%p986_p10)
}
  0x1a   :  { %s990_s8 = scalar_lea.vmem %s29_s27, 4096  ;;  %p995_p12 = scmp.lt.s32.totalorder %s29_s27, %s29_s27 }
  0x1b   :  { %p991_p11 = scmp.ne.s32.totalorder %s29_s27, %s990_s8  ;;  %p996_p13 = scmp.lt.s32.totalorder %s990_s8, %s990_s8 }
  0x1d   :  { %p997_p0 = por %p996_p13, %p995_p12 }
  0x1f   :  { %p998_p1 = pnand %p997_p0, %p991_p11 }
  0x21   :  { %1001 = shalt.err (!%p998_p1)
}
  0x22   :  { %s1034_s0 = smov 256   ;;  %s1035_s9 = smov 16  }
  0x23   :  { %34 = dma.hbm_to_vmem [thread:$0]  %s1192_s1, 4096, %s29_s27, [#allocation6], %s1034_s0, %s1034_s0, %s1035_s9  }
  0x24   :  { %1024 = dma.done.wait [#allocation3], 1024  }
  0x25   :  { %1025 = vsyncadd [#allocation3], 4294966272 }
  0x26   :  { %1026 = dma.done.wait [#allocation6], 4096  }
  0x27   :  { %1027 = vsyncadd [#allocation6], 4294963200  ;;  %v1036_v0 = vmov 0   ;;  %v902_v1 = vld [vmem:[#allocation5 + $0x4] ss:$16 sps:$4 sm:$0xff]   ;;  %v951_v34 = vld [vmem:[#allocation2 + $0x8] sm:$0xff]   ;;  %v94_v41 = vlaneseq }
  0x28   :  { %354 = vmatprep.mubr.bf16.mxu0 %v1036_v0  ;;  %467 = vmatprep.mubr.bf16.mxu1 %v1036_v0  ;;  %v904_v2 = vld [vmem:[#allocation5 + $0xc] ss:$16 sps:$4 sm:$0xff]   ;;  %v906_v3 = vld [vmem:[#allocation5] ss:$16 sps:$4 sm:$0xff]   ;;  %v907_v4 = vld [vmem:[#allocation5 + $0x8] ss:$16 sps:$4 sm:$0xff]  }
  0x29   :  { %322 = vmatprep.subr.bf16.mxu0 %v902_v1  ;;  %435 = vmatprep.subr.bf16.mxu1 %v904_v2  ;;  %v908_v5 = vld [vmem:[#allocation5 + $0x24] ss:$16 sps:$4 sm:$0xff]   ;;  %v910_v6 = vld [vmem:[#allocation5 + $0x2c] ss:$16 sps:$4 sm:$0xff]   ;;  %v912_v7 = vld [vmem:[#allocation5 + $0x20] ss:$16 sps:$4 sm:$0xff]  }
  0x2a   :  { %323 = vmatpush1.bf16.msra.mxu0 %v906_v3  ;;  %436 = vmatpush1.bf16.msra.mxu1 %v907_v4  ;;  %v913_v8 = vld [vmem:[#allocation5 + $0x28] ss:$16 sps:$4 sm:$0xff]   ;;  %v914_v9 = vld [vmem:[#allocation5 + $0x44] ss:$16 sps:$4 sm:$0xff]   ;;  %v916_v10 = vld [vmem:[#allocation5 + $0x4c] ss:$16 sps:$4 sm:$0xff]  }
  0x2b   :  { %324 = vmatprep.subr.bf16.mxu0 %v908_v5  ;;  %437 = vmatprep.subr.bf16.mxu1 %v910_v6  ;;  %v918_v11 = vld [vmem:[#allocation5 + $0x40] ss:$16 sps:$4 sm:$0xff]   ;;  %v919_v12 = vld [vmem:[#allocation5 + $0x48] ss:$16 sps:$4 sm:$0xff]   ;;  %v920_v13 = vld [vmem:[#allocation5 + $0x64] ss:$16 sps:$4 sm:$0xff]  }
  0x2c   :  { %v922_v14 = vld [vmem:[#allocation5 + $0x6c] ss:$16 sps:$4 sm:$0xff]   ;;  %v924_v15 = vld [vmem:[#allocation5 + $0x60] ss:$16 sps:$4 sm:$0xff]   ;;  %v925_v16 = vld [vmem:[#allocation5 + $0x68] ss:$16 sps:$4 sm:$0xff]  }
  0x2d   :  { %v926_v17 = vld [vmem:[#allocation5 + $0x84] ss:$16 sps:$4 sm:$0xff]   ;;  %v928_v18 = vld [vmem:[#allocation5 + $0x8c] ss:$16 sps:$4 sm:$0xff]   ;;  %v930_v19 = vld [vmem:[#allocation5 + $0x80] ss:$16 sps:$4 sm:$0xff]  }
  0x2e   :  { %325 = vmatpush1.bf16.msra.mxu0 %v912_v7  ;;  %438 = vmatpush1.bf16.msra.mxu1 %v913_v8  ;;  %v931_v20 = vld [vmem:[#allocation5 + $0x88] ss:$16 sps:$4 sm:$0xff]   ;;  %v932_v21 = vld [vmem:[#allocation5 + $0xa4] ss:$16 sps:$4 sm:$0xff]   ;;  %v934_v22 = vld [vmem:[#allocation5 + $0xac] ss:$16 sps:$4 sm:$0xff]  }
  0x2f   :  { %326 = vmatprep.subr.bf16.mxu0 %v914_v9  ;;  %439 = vmatprep.subr.bf16.mxu1 %v916_v10  ;;  %v936_v23 = vld [vmem:[#allocation5 + $0xa0] ss:$16 sps:$4 sm:$0xff]   ;;  %v937_v24 = vld [vmem:[#allocation5 + $0xa8] ss:$16 sps:$4 sm:$0xff]   ;;  %v938_v25 = vld [vmem:[#allocation5 + $0xc4] ss:$16 sps:$4 sm:$0xff]  }
  0x30   :  { %v940_v26 = vld [vmem:[#allocation5 + $0xcc] ss:$16 sps:$4 sm:$0xff]   ;;  %v942_v27 = vld [vmem:[#allocation5 + $0xc0] ss:$16 sps:$4 sm:$0xff]   ;;  %v943_v28 = vld [vmem:[#allocation5 + $0xc8] ss:$16 sps:$4 sm:$0xff]  }
  0x31   :  { %v944_v29 = vld [vmem:[#allocation5 + $0xe4] ss:$16 sps:$4 sm:$0xff]   ;;  %v946_v30 = vld [vmem:[#allocation5 + $0xec] ss:$16 sps:$4 sm:$0xff]   ;;  %v948_v31 = vld [vmem:[#allocation5 + $0xe0] ss:$16 sps:$4 sm:$0xff]  }
  0x32   :  { %327 = vmatpush1.bf16.msra.mxu0 %v918_v11  ;;  %440 = vmatpush1.bf16.msra.mxu1 %v919_v12  ;;  %v949_v32 = vld [vmem:[#allocation5 + $0xe8] ss:$16 sps:$4 sm:$0xff]   ;;  %v950_v33 = vld [vmem:[#allocation2] sm:$0xff]   ;;  %v952_v35 = vld [vmem:[#allocation2 + $0x10] sm:$0xff]   ;;  %v95_v42 = vshrl.u32 %v94_v41, 7 }
  0x33   :  { %328 = vmatprep.subr.bf16.mxu0 %v920_v13  ;;  %441 = vmatprep.subr.bf16.mxu1 %v922_v14  ;;  %v953_v36 = vld [vmem:[#allocation2 + $0x18] sm:$0xff]   ;;  %v954_v37 = vld [vmem:[#allocation2 + $0x20] sm:$0xff]   ;;  %v955_v38 = vld [vmem:[#allocation2 + $0x28] sm:$0xff]  }
  0x34   :  { %v956_v39 = vld [vmem:[#allocation2 + $0x30] sm:$0xff]   ;;  %v957_v40 = vld [vmem:[#allocation2 + $0x38] sm:$0xff]   ;;  %v96_v43 = vsub.s32 0, %v95_v42  ;;  %v104_v44 = vsub.s32 2, %v95_v42  ;;  %v92_v45 = vld [vmem:[%s1193_s2] sm:$0xf] }
  0x35   :  { %v100_v46 = vsub.s32 1, %v95_v42  ;;  %v108_v47 = vsub.s32 3, %v95_v42  ;;  %s1037_s2 = smov [#allocation7]  }
  0x36   :  { %329 = vmatpush1.bf16.msra.mxu0 %v924_v15  ;;  %442 = vmatpush1.bf16.msra.mxu1 %v925_v16  ;;  %v1104_v48 = vrot.slane %v92_v45, %v96_v43  ;;  %v1106_v49 = vrot.slane %v92_v45, %v104_v44  ;;  %s777_s13 = sshll.u32 %s1037_s2, 4  ;;  %s778_s13 = int_to_ptr.vmem [resolvable:$true] %s777_s13 }
  0x37   :  { %330 = vmatprep.subr.bf16.mxu0 %v926_v17  ;;  %443 = vmatprep.subr.bf16.mxu1 %v928_v18  ;;  %v1108_v50 = vrot.slane %v92_v45, %v100_v46  ;;  %v1110_v51 = vrot.slane %v92_v45, %v108_v47  ;;  %s1002_s14 = scalar_lea.vmem %s778_s13, 4096  ;;  %p1007_p3 = scmp.lt.s32.totalorder %s778_s13, %s778_s13 }
  0x38   :  { %p1003_p2 = scmp.ne.s32.totalorder %s778_s13, %s1002_s14  ;;  %p1008_p4 = scmp.lt.s32.totalorder %s1002_s14, %s1002_s14 }
  0x3a   :  { %331 = vmatpush1.bf16.msra.mxu0 %v930_v19  ;;  %444 = vmatpush1.bf16.msra.mxu1 %v931_v20  ;;  %p1009_p5 = por %p1008_p4, %p1007_p3 }
  0x3b   :  { %332 = vmatprep.subr.bf16.mxu0 %v932_v21  ;;  %445 = vmatprep.subr.bf16.mxu1 %v934_v22 }
  0x3c   :  { %p1010_p6 = pnand %p1009_p5, %p1003_p2 }
  0x3e   :  { %333 = vmatpush1.bf16.msra.mxu0 %v936_v23  ;;  %446 = vmatpush1.bf16.msra.mxu1 %v937_v24 }
  0x3f   :  { %334 = vmatprep.subr.bf16.mxu0 %v938_v25  ;;  %447 = vmatprep.subr.bf16.mxu1 %v940_v26 }
  0x42   :  { %335 = vmatpush1.bf16.msra.mxu0 %v942_v27  ;;  %448 = vmatpush1.bf16.msra.mxu1 %v943_v28 }
  0x43   :  { %336 = vmatprep.subr.bf16.mxu0 %v944_v29  ;;  %449 = vmatprep.subr.bf16.mxu1 %v946_v30 }
  0x46   :  { %337 = vmatpush1.bf16.msra.mxu0 %v948_v31  ;;  %450 = vmatpush1.bf16.msra.mxu1 %v949_v32 }
  0x49   :  { %355 = vmatmul.mubr.bf16.vlgmr.msra.gmra.mrb[0].mxu0 %v950_v33  ;;  %468 = vmatmul.mubr.bf16.vlgmr.msra.gmra.mrb[0].mxu1 %v950_v33 }
  0x4a   :  { %364 = vmatprep.mubr.bf16.mxu0 %v1036_v0  ;;  %477 = vmatprep.mubr.bf16.mxu1 %v1036_v0 }
  0x51   :  { %365 = vmatmul.mubr.bf16.gmra.mrb[4].mxu0 %v951_v34  ;;  %478 = vmatmul.mubr.bf16.gmra.mrb[4].mxu1 %v951_v34 }
  0x52   :  { %374 = vmatprep.mubr.bf16.mxu0 %v1036_v0  ;;  %487 = vmatprep.mubr.bf16.mxu1 %v1036_v0 }
  0x59   :  { %375 = vmatmul.mubr.bf16.gmra.mrb[8].mxu0 %v952_v35  ;;  %488 = vmatmul.mubr.bf16.gmra.mrb[8].mxu1 %v952_v35 }
  0x5a   :  { %384 = vmatprep.mubr.bf16.mxu0 %v1036_v0  ;;  %497 = vmatprep.mubr.bf16.mxu1 %v1036_v0 }
  0x61   :  { %385 = vmatmul.mubr.bf16.gmra.mrb[12].mxu0 %v953_v36  ;;  %498 = vmatmul.mubr.bf16.gmra.mrb[12].mxu1 %v953_v36 }
  0x62   :  { %394 = vmatprep.mubr.bf16.mxu0 %v1036_v0  ;;  %507 = vmatprep.mubr.bf16.mxu1 %v1036_v0 }
  0x69   :  { %395 = vmatmul.mubr.bf16.gmra.mrb[16].mxu0 %v954_v37  ;;  %508 = vmatmul.mubr.bf16.gmra.mrb[16].mxu1 %v954_v37 }
  0x6a   :  { %404 = vmatprep.mubr.bf16.mxu0 %v1036_v0  ;;  %517 = vmatprep.mubr.bf16.mxu1 %v1036_v0 }
  0x71   :  { %405 = vmatmul.mubr.bf16.gmra.mrb[20].mxu0 %v955_v38  ;;  %518 = vmatmul.mubr.bf16.gmra.mrb[20].mxu1 %v955_v38 }
  0x72   :  { %414 = vmatprep.mubr.bf16.mxu0 %v1036_v0  ;;  %527 = vmatprep.mubr.bf16.mxu1 %v1036_v0 }
  0x79   :  { %415 = vmatmul.mubr.bf16.gmra.mrb[24].mxu0 %v956_v39  ;;  %528 = vmatmul.mubr.bf16.gmra.mrb[24].mxu1 %v956_v39 }
  0x7a   :  { %424 = vmatprep.mubr.bf16.mxu0 %v1036_v0  ;;  %537 = vmatprep.mubr.bf16.mxu1 %v1036_v0 }
  0x81   :  { %425 = vmatmul.mubr.bf16.gmra.mrb[28].mxu0 %v957_v40  ;;  %538 = vmatmul.mubr.bf16.gmra.mrb[28].mxu1 %v957_v40 }
 0x11c   :  { %v356_v52 = vpop.f32.mrb[0].mxu0  ;;  %v469_v53 = vpop.f32.mrb[0].mxu1 }
 0x11d   :  { %v357_v54 = vadd.f32 %v356_v52, %v1104_v48  ;;  %v470_v55 = vadd.f32 %v469_v53, %v1106_v49  ;;  %v358_v56 = vpop.f32.mrb[1].mxu0  ;;  %v471_v57 = vpop.f32.mrb[1].mxu1 }
 0x11e   :  { %v359_v58 = vadd.f32 %v358_v56, %v1108_v50  ;;  %v472_v59 = vadd.f32 %v471_v57, %v1110_v51  ;;  %v360_v60 = vpop.f32.mrb[2].mxu0  ;;  %v473_v61 = vpop.f32.mrb[2].mxu1 }
 0x11f   :  { %v361_v62 = vadd.f32 %v360_v60, %v1104_v48  ;;  %v474_v63 = vadd.f32 %v473_v61, %v1106_v49  ;;  %v362_v0 = vpop.f32.mrb[3].mxu0  ;;  %v475_v1 = vpop.f32.mrb[3].mxu1 }
 0x120   :  { %v862_v2 = vpack.c.bf16 %v359_v58, %v357_v54  ;;  %v863_v3 = vpack.c.bf16 %v472_v59, %v470_v55  ;;  %v363_v4 = vadd.f32 %v362_v0, %v1108_v50  ;;  %v476_v5 = vadd.f32 %v475_v1, %v1110_v51 }
 0x122   :  { %740 = vst [vmem:[#allocation7] sm:$0xff] %v862_v2  ;;  %741 = vst [vmem:[#allocation7 + $0x8] sm:$0xff] %v863_v3  ;;  %v864_v6 = vpack.c.bf16 %v363_v4, %v361_v62  ;;  %v865_v7 = vpack.c.bf16 %v476_v5, %v474_v63 }
 0x124   :  { %742 = vst [vmem:[#allocation7 + $0x10] sm:$0xff] %v864_v6  ;;  %743 = vst [vmem:[#allocation7 + $0x18] sm:$0xff] %v865_v7  ;;  %v366_v8 = vpop.f32.mrb[4].mxu0  ;;  %v479_v9 = vpop.f32.mrb[4].mxu1 }
 0x125   :  { %v367_v10 = vadd.f32 %v366_v8, %v1104_v48  ;;  %v480_v11 = vadd.f32 %v479_v9, %v1106_v49  ;;  %v368_v12 = vpop.f32.mrb[5].mxu0  ;;  %v481_v13 = vpop.f32.mrb[5].mxu1 }
 0x126   :  { %v369_v14 = vadd.f32 %v368_v12, %v1108_v50  ;;  %v482_v15 = vadd.f32 %v481_v13, %v1110_v51  ;;  %v370_v16 = vpop.f32.mrb[6].mxu0  ;;  %v483_v17 = vpop.f32.mrb[6].mxu1 }
 0x127   :  { %v371_v18 = vadd.f32 %v370_v16, %v1104_v48  ;;  %v484_v19 = vadd.f32 %v483_v17, %v1106_v49  ;;  %v372_v20 = vpop.f32.mrb[7].mxu0  ;;  %v485_v21 = vpop.f32.mrb[7].mxu1 }
 0x128   :  { %v866_v22 = vpack.c.bf16 %v369_v14, %v367_v10  ;;  %v867_v23 = vpack.c.bf16 %v482_v15, %v480_v11  ;;  %v373_v24 = vadd.f32 %v372_v20, %v1108_v50  ;;  %v486_v25 = vadd.f32 %v485_v21, %v1110_v51 }
 0x12a   :  { %744 = vst [vmem:[#allocation7 + $0x20] sm:$0xff] %v866_v22  ;;  %745 = vst [vmem:[#allocation7 + $0x28] sm:$0xff] %v867_v23  ;;  %v868_v26 = vpack.c.bf16 %v373_v24, %v371_v18  ;;  %v869_v27 = vpack.c.bf16 %v486_v25, %v484_v19 }
 0x12c   :  { %746 = vst [vmem:[#allocation7 + $0x30] sm:$0xff] %v868_v26  ;;  %747 = vst [vmem:[#allocation7 + $0x38] sm:$0xff] %v869_v27  ;;  %v376_v28 = vpop.f32.mrb[8].mxu0  ;;  %v489_v29 = vpop.f32.mrb[8].mxu1 }
 0x12d   :  { %v377_v30 = vadd.f32 %v376_v28, %v1104_v48  ;;  %v490_v31 = vadd.f32 %v489_v29, %v1106_v49  ;;  %v378_v32 = vpop.f32.mrb[9].mxu0  ;;  %v491_v33 = vpop.f32.mrb[9].mxu1 }
 0x12e   :  { %v379_v34 = vadd.f32 %v378_v32, %v1108_v50  ;;  %v492_v35 = vadd.f32 %v491_v33, %v1110_v51  ;;  %v380_v36 = vpop.f32.mrb[10].mxu0  ;;  %v493_v37 = vpop.f32.mrb[10].mxu1 }
 0x12f   :  { %v381_v38 = vadd.f32 %v380_v36, %v1104_v48  ;;  %v494_v39 = vadd.f32 %v493_v37, %v1106_v49  ;;  %v382_v40 = vpop.f32.mrb[11].mxu0  ;;  %v495_v41 = vpop.f32.mrb[11].mxu1 }
 0x130   :  { %v870_v42 = vpack.c.bf16 %v379_v34, %v377_v30  ;;  %v871_v43 = vpack.c.bf16 %v492_v35, %v490_v31  ;;  %v383_v44 = vadd.f32 %v382_v40, %v1108_v50  ;;  %v496_v45 = vadd.f32 %v495_v41, %v1110_v51 }
 0x132   :  { %748 = vst [vmem:[#allocation7 + $0x40] sm:$0xff] %v870_v42  ;;  %749 = vst [vmem:[#allocation7 + $0x48] sm:$0xff] %v871_v43  ;;  %v872_v46 = vpack.c.bf16 %v383_v44, %v381_v38  ;;  %v873_v47 = vpack.c.bf16 %v496_v45, %v494_v39 }
 0x134   :  { %750 = vst [vmem:[#allocation7 + $0x50] sm:$0xff] %v872_v46  ;;  %751 = vst [vmem:[#allocation7 + $0x58] sm:$0xff] %v873_v47  ;;  %v386_v52 = vpop.f32.mrb[12].mxu0  ;;  %v499_v53 = vpop.f32.mrb[12].mxu1 }
 0x135   :  { %v387_v54 = vadd.f32 %v386_v52, %v1104_v48  ;;  %v500_v55 = vadd.f32 %v499_v53, %v1106_v49  ;;  %v388_v56 = vpop.f32.mrb[13].mxu0  ;;  %v501_v57 = vpop.f32.mrb[13].mxu1 }
 0x136   :  { %v389_v58 = vadd.f32 %v388_v56, %v1108_v50  ;;  %v502_v59 = vadd.f32 %v501_v57, %v1110_v51  ;;  %v390_v60 = vpop.f32.mrb[14].mxu0  ;;  %v503_v61 = vpop.f32.mrb[14].mxu1 }
 0x137   :  { %v391_v62 = vadd.f32 %v390_v60, %v1104_v48  ;;  %v504_v63 = vadd.f32 %v503_v61, %v1106_v49  ;;  %v392_v0 = vpop.f32.mrb[15].mxu0  ;;  %v505_v1 = vpop.f32.mrb[15].mxu1 }
 0x138   :  { %v874_v2 = vpack.c.bf16 %v389_v58, %v387_v54  ;;  %v875_v3 = vpack.c.bf16 %v502_v59, %v500_v55  ;;  %v393_v4 = vadd.f32 %v392_v0, %v1108_v50  ;;  %v506_v5 = vadd.f32 %v505_v1, %v1110_v51 }
 0x13a   :  { %752 = vst [vmem:[#allocation7 + $0x60] sm:$0xff] %v874_v2  ;;  %753 = vst [vmem:[#allocation7 + $0x68] sm:$0xff] %v875_v3  ;;  %v876_v6 = vpack.c.bf16 %v393_v4, %v391_v62  ;;  %v877_v7 = vpack.c.bf16 %v506_v5, %v504_v63 }
 0x13c   :  { %754 = vst [vmem:[#allocation7 + $0x70] sm:$0xff] %v876_v6  ;;  %755 = vst [vmem:[#allocation7 + $0x78] sm:$0xff] %v877_v7  ;;  %v396_v8 = vpop.f32.mrb[16].mxu0  ;;  %v509_v9 = vpop.f32.mrb[16].mxu1 }
 0x13d   :  { %v397_v10 = vadd.f32 %v396_v8, %v1104_v48  ;;  %v510_v11 = vadd.f32 %v509_v9, %v1106_v49  ;;  %v398_v12 = vpop.f32.mrb[17].mxu0  ;;  %v511_v13 = vpop.f32.mrb[17].mxu1 }
 0x13e   :  { %v399_v14 = vadd.f32 %v398_v12, %v1108_v50  ;;  %v512_v15 = vadd.f32 %v511_v13, %v1110_v51  ;;  %v400_v16 = vpop.f32.mrb[18].mxu0  ;;  %v513_v17 = vpop.f32.mrb[18].mxu1 }
 0x13f   :  { %v401_v18 = vadd.f32 %v400_v16, %v1104_v48  ;;  %v514_v19 = vadd.f32 %v513_v17, %v1106_v49  ;;  %v402_v20 = vpop.f32.mrb[19].mxu0  ;;  %v515_v21 = vpop.f32.mrb[19].mxu1 }
 0x140   :  { %v878_v22 = vpack.c.bf16 %v399_v14, %v397_v10  ;;  %v879_v23 = vpack.c.bf16 %v512_v15, %v510_v11  ;;  %v403_v24 = vadd.f32 %v402_v20, %v1108_v50  ;;  %v516_v25 = vadd.f32 %v515_v21, %v1110_v51 }
 0x142   :  { %756 = vst [vmem:[#allocation7 + $0x80] sm:$0xff] %v878_v22  ;;  %757 = vst [vmem:[#allocation7 + $0x88] sm:$0xff] %v879_v23  ;;  %v880_v26 = vpack.c.bf16 %v403_v24, %v401_v18  ;;  %v881_v27 = vpack.c.bf16 %v516_v25, %v514_v19 }
 0x144   :  { %758 = vst [vmem:[#allocation7 + $0x90] sm:$0xff] %v880_v26  ;;  %759 = vst [vmem:[#allocation7 + $0x98] sm:$0xff] %v881_v27  ;;  %v406_v28 = vpop.f32.mrb[20].mxu0  ;;  %v519_v29 = vpop.f32.mrb[20].mxu1 }
 0x145   :  { %v407_v30 = vadd.f32 %v406_v28, %v1104_v48  ;;  %v520_v31 = vadd.f32 %v519_v29, %v1106_v49  ;;  %v408_v32 = vpop.f32.mrb[21].mxu0  ;;  %v521_v33 = vpop.f32.mrb[21].mxu1 }
 0x146   :  { %v409_v34 = vadd.f32 %v408_v32, %v1108_v50  ;;  %v522_v35 = vadd.f32 %v521_v33, %v1110_v51  ;;  %v410_v36 = vpop.f32.mrb[22].mxu0  ;;  %v523_v37 = vpop.f32.mrb[22].mxu1 }
 0x147   :  { %v411_v38 = vadd.f32 %v410_v36, %v1104_v48  ;;  %v524_v39 = vadd.f32 %v523_v37, %v1106_v49  ;;  %v412_v40 = vpop.f32.mrb[23].mxu0  ;;  %v525_v41 = vpop.f32.mrb[23].mxu1 }
 0x148   :  { %v882_v42 = vpack.c.bf16 %v409_v34, %v407_v30  ;;  %v883_v43 = vpack.c.bf16 %v522_v35, %v520_v31  ;;  %v413_v44 = vadd.f32 %v412_v40, %v1108_v50  ;;  %v526_v45 = vadd.f32 %v525_v41, %v1110_v51 }
 0x14a   :  { %760 = vst [vmem:[#allocation7 + $0xa0] sm:$0xff] %v882_v42  ;;  %761 = vst [vmem:[#allocation7 + $0xa8] sm:$0xff] %v883_v43  ;;  %v884_v46 = vpack.c.bf16 %v413_v44, %v411_v38  ;;  %v885_v47 = vpack.c.bf16 %v526_v45, %v524_v39 }
 0x14c   :  { %762 = vst [vmem:[#allocation7 + $0xb0] sm:$0xff] %v884_v46  ;;  %763 = vst [vmem:[#allocation7 + $0xb8] sm:$0xff] %v885_v47  ;;  %v416_v52 = vpop.f32.mrb[24].mxu0  ;;  %v529_v53 = vpop.f32.mrb[24].mxu1 }
 0x14d   :  { %v417_v54 = vadd.f32 %v416_v52, %v1104_v48  ;;  %v530_v55 = vadd.f32 %v529_v53, %v1106_v49  ;;  %v418_v56 = vpop.f32.mrb[25].mxu0  ;;  %v531_v57 = vpop.f32.mrb[25].mxu1 }
 0x14e   :  { %v419_v58 = vadd.f32 %v418_v56, %v1108_v50  ;;  %v532_v59 = vadd.f32 %v531_v57, %v1110_v51  ;;  %v420_v60 = vpop.f32.mrb[26].mxu0  ;;  %v533_v61 = vpop.f32.mrb[26].mxu1 }
 0x14f   :  { %v421_v62 = vadd.f32 %v420_v60, %v1104_v48  ;;  %v534_v63 = vadd.f32 %v533_v61, %v1106_v49  ;;  %v422_v0 = vpop.f32.mrb[27].mxu0  ;;  %v535_v1 = vpop.f32.mrb[27].mxu1 }
 0x150   :  { %v886_v2 = vpack.c.bf16 %v419_v58, %v417_v54  ;;  %v887_v3 = vpack.c.bf16 %v532_v59, %v530_v55  ;;  %v423_v4 = vadd.f32 %v422_v0, %v1108_v50  ;;  %v536_v5 = vadd.f32 %v535_v1, %v1110_v51 }
 0x152   :  { %764 = vst [vmem:[#allocation7 + $0xc0] sm:$0xff] %v886_v2  ;;  %765 = vst [vmem:[#allocation7 + $0xc8] sm:$0xff] %v887_v3  ;;  %v888_v6 = vpack.c.bf16 %v423_v4, %v421_v62  ;;  %v889_v7 = vpack.c.bf16 %v536_v5, %v534_v63 }
 0x154   :  { %766 = vst [vmem:[#allocation7 + $0xd0] sm:$0xff] %v888_v6  ;;  %767 = vst [vmem:[#allocation7 + $0xd8] sm:$0xff] %v889_v7  ;;  %v426_v8 = vpop.f32.mrb[28].mxu0  ;;  %v539_v9 = vpop.f32.mrb[28].mxu1 }
 0x155   :  { %v427_v10 = vadd.f32 %v426_v8, %v1104_v48  ;;  %v540_v11 = vadd.f32 %v539_v9, %v1106_v49  ;;  %v428_v12 = vpop.f32.mrb[29].mxu0  ;;  %v541_v13 = vpop.f32.mrb[29].mxu1 }
 0x156   :  { %v429_v14 = vadd.f32 %v428_v12, %v1108_v50  ;;  %v542_v15 = vadd.f32 %v541_v13, %v1110_v51  ;;  %v430_v16 = vpop.f32.mrb[30].mxu0  ;;  %v543_v17 = vpop.f32.mrb[30].mxu1 }
 0x157   :  { %v431_v18 = vadd.f32 %v430_v16, %v1104_v48  ;;  %v544_v19 = vadd.f32 %v543_v17, %v1106_v49  ;;  %v432_v20 = vpop.f32.mrb[31].mxu0  ;;  %v545_v21 = vpop.f32.mrb[31].mxu1 }
 0x158   :  { %v890_v22 = vpack.c.bf16 %v429_v14, %v427_v10  ;;  %v891_v23 = vpack.c.bf16 %v542_v15, %v540_v11  ;;  %v433_v24 = vadd.f32 %v432_v20, %v1108_v50  ;;  %v546_v25 = vadd.f32 %v545_v21, %v1110_v51 }
 0x15a   :  { %768 = vst [vmem:[#allocation7 + $0xe0] sm:$0xff] %v890_v22  ;;  %769 = vst [vmem:[#allocation7 + $0xe8] sm:$0xff] %v891_v23  ;;  %v892_v26 = vpack.c.bf16 %v433_v24, %v431_v18  ;;  %v893_v27 = vpack.c.bf16 %v546_v25, %v544_v19 }
 0x15c   :  { %770 = vst [vmem:[#allocation7 + $0xf0] sm:$0xff] %v892_v26  ;;  %771 = vst [vmem:[#allocation7 + $0xf8] sm:$0xff] %v893_v27 }
 0x15d   :  { %1013 = shalt.err (!%p1010_p6)
}
 0x15e   :  { %s1014_s17 = scalar_lea.hbm %s1194_s3, 4096 }
 0x15f   :  { %p1015_p7 = scmp.ne.s32.totalorder %s1194_s3, %s1014_s17  ;;  %p1018_p8 = scmp.lt.u32.totalorder %s1014_s17, %s1194_s3 }
 0x161   :  { %p1020_p9 = pnand %p1018_p8, %p1015_p7 }
 0x163   :  { %1023 = shalt.err (!%p1020_p9)
}
 0x164   :  { %783 = dma.vmem_to_hbm [thread:$0]  %s778_s13, 4096, %s1194_s3, [#allocation4], %s1034_s0, %s1034_s0, %s1035_s9  }
 0x165   :  { %1028 = dma.done.wait [#allocation4], 4096  }
 0x166   :  { %1029 = vsyncadd [#allocation4], 4294963200 }
 0x167   :  { %787 = vsyncpa [#allocation3], 1 }
 0x168   :  { %788 = vsyncpa [#allocation6], 1 }
 0x169   :  { %789 = vsyncpa [#allocation4], 1 }

</bundles_post_ra>
